<compile_context>
chip_gen: v7x
topology: tpu7x:2x2x1
jax: 0.10.0
libtpu: 0.0.40
codegen_flags: <defaults>
</compile_context>

<pallas_src>
import functools

import jax
import jax.numpy as jnp
from jax.experimental import pallas as pl
from jax.experimental.pallas import tpu as pltpu

BASE_SIGNAL = 0.1     # base_signal
MAX_SIGNAL = 0.0001   # max_signal
NOISE_SCALE = 1.0     # noise_scale default torch.tensor(1.0)
PACK = 4              # batch rows packed per 128-lane group (4 * H(=32) = 128)


# ----------------------------- fused Pallas kernel --------------------------


def _rollout_kernel(T, K, p,
                    theta_ref, eps_ref, pool_ref,
                    emi_w1_ref, emi_b1_ref, emi_w2_ref, emi_b2_ref,
                    enc_w1x_ref, enc_w1y_ref, enc_b1_ref, enc_w2_ref,
                    enc_b2_ref,
                    out_ref):
    """One batch block of the whole T-step rollout (lane-packed by PACK).

    theta_ref : (K, bt4, PACK*p)   latent locations, packed 4 rows / group
    eps_ref   : (T, bt4, PACK)     standard-normal noise, packed
    pool_ref  : (PACK*p, PACK)     constant group-sum matrix (ones blocks)
    out_ref   : (bt4, T*PACK*(p+1)) combined [xi_1, y_1, ..., xi_T, y_T] slab
    """
    bt4 = out_ref.shape[0]

    # Weights & pool matrix stay VMEM-resident for the whole block.
    emi_w1 = emi_w1_ref[...]                 # (4H, 4H) block-diagonal
    emi_b1 = emi_b1_ref[...]                 # (1, 4H)
    emi_w2 = emi_w2_ref[...]                 # (4H, 4p) block-diagonal
    emi_b2 = emi_b2_ref[...]                 # (1, 4p)
    enc_w1x = enc_w1x_ref[...]               # (4p, 4H) block-diagonal
    enc_w1y = enc_w1y_ref[...]               # (4,  4H) block-diagonal
    enc_b1 = enc_b1_ref[...]                 # (1, 4H)
    enc_w2 = enc_w2_ref[...]                 # (4H, 4H) block-diagonal
    enc_b2 = enc_b2_ref[...]                 # (1, 4H)
    pool = pool_ref[...]                     # (4p, PACK)

    H4 = emi_w1.shape[1]
    rep = jnp.zeros((bt4, H4), jnp.float32)  # pooled history, carried in regs
    chunks = []

    # T is tiny & static -> unroll.  TODO(synk): move to lax.fori_loop with a
    # VMEM scratch accumulator for `rep` if T ever becomes large.
    for t in range(T):
        # ---- emitter MLP: xi_{t+1} = relu(rep @ W1 + b1) @ W2 + b2 ----
        h = jnp.dot(rep, emi_w1, preferred_element_type=jnp.float32) + emi_b1
        h = jnp.maximum(h, 0.0)
        xi = jnp.dot(h, emi_w2, preferred_element_type=jnp.float32) + emi_b2
        # xi : (bt4, PACK*p)

        # ---- forward map: mean = log(base + sum_k 1/(max + ||xi-th_k||^2))
        s = jnp.zeros((bt4, PACK), jnp.float32)
        for k in range(K):                   # leading-axis index: free
            diff = xi - theta_ref[k]                                # (bt4, 4p)
            sq = jnp.dot(diff * diff, pool,
                         preferred_element_type=jnp.float32)        # (bt4, 4)
            s = s + 1.0 / (MAX_SIGNAL + sq)   # exact recip (matches reference)
        mean = jnp.log(BASE_SIGNAL + s)                              # (bt4, 4)

        # y_{t+1} ~ Normal(mean, noise_scale)  (reparameterized)
        y = mean + NOISE_SCALE * eps_ref[t]                          # (bt4, 4)

        chunks.append(xi)
        chunks.append(y)

        # ---- encoder MLP on [xi, y] without the concat:
        #      relu(xi @ W1[:p] + y @ W1[p] + b1) @ W2 + b2 ----
        g = (jnp.dot(xi, enc_w1x, preferred_element_type=jnp.float32)
             + jnp.dot(y, enc_w1y, preferred_element_type=jnp.float32)
             + enc_b1)
        g = jnp.maximum(g, 0.0)
        enc = jnp.dot(g, enc_w2, preferred_element_type=jnp.float32) + enc_b2
        rep = rep + enc                      # sum-pooled history update

    # One full-width store per block (no per-step narrow masked stores).
    out_ref[...] = jnp.concatenate(chunks, axis=-1)


# --------------------------- host-side plumbing ------------------------------


def _round_up(x, m):
    return (x + m - 1) // m * m


def _block_diag4(w):
    """4-way block-diagonal replication of a (fi, fo) matrix -> (4fi, 4fo)."""
    fi, fo = w.shape
    out = jnp.zeros((PACK * fi, PACK * fo), jnp.float32)
    for r in range(PACK):
        out = out.at[r * fi:(r + 1) * fi, r * fo:(r + 1) * fo].set(w)
    return out


def _tile4(b):
    """Tile a (1, f) bias 4x along lanes -> (1, 4f)."""
    return jnp.tile(b.astype(jnp.float32), (1, PACK))


def rollout(theta, eps, params, T, K, p, block_rows_packed=256):
    """Single fused pallas_call (grid over batch) for the whole rollout.

    Returns (designs, observations): lists of (B, p) and (B, 1) arrays.
    """
    B = theta.shape[0]
    P4 = PACK * p
    W = T * (P4 + PACK)                      # combined output slab width

    # ---- pad batch so it packs PACK rows per group and tiles the grid ----
    B4 = _round_up(B, PACK) // PACK
    bt4 = _round_up(min(block_rows_packed, B4), 8)   # sublane-aligned block
    B4p = _round_up(B4, bt4)
    Bp = PACK * B4p
    grid = (B4p // bt4,)

    pad = Bp - B
    theta_p = jnp.pad(theta.astype(jnp.float32), ((0, pad), (0, 0), (0, 0)))
    eps_p = jnp.pad(eps.astype(jnp.float32), ((0, pad), (0, 0)))

    # ---- lane-pack PACK batch rows per group ----
    theta_packed = jnp.transpose(theta_p, (1, 0, 2)).reshape(K, B4p, P4)
    eps_packed = eps_p.T.reshape(T, B4p, PACK)

    # group-sum pooling matrix: pool[r*p + j, r'] = 1 iff r == r'
    pool = jnp.repeat(jnp.eye(PACK, dtype=jnp.float32), p, axis=0)   # (4p, 4)

    enc_w1 = params["enc_w1"]                # (p+1, H)
    enc_w1x = enc_w1[:p, :]                  # rows acting on xi
    enc_w1y = enc_w1[p:p + 1, :]             # row acting on y

    weights = (
        _block_diag4(params["emi_w1"]), _tile4(params["emi_b1"]),
        _block_diag4(params["emi_w2"]), _tile4(params["emi_b2"]),
        _block_diag4(enc_w1x), _block_diag4(enc_w1y), _tile4(params["enc_b1"]),
        _block_diag4(params["enc_w2"]), _tile4(params["enc_b2"]),
    )

    def const_spec(x):
        nd = x.ndim
        return pl.BlockSpec(x.shape, lambda i, _nd=nd: (0,) * _nd)

    in_specs = (
        [pl.BlockSpec((K, bt4, P4), lambda i: (0, i, 0)),      # theta (tiled)
         pl.BlockSpec((T, bt4, PACK), lambda i: (0, i, 0)),    # eps   (tiled)
         const_spec(pool)]
        + [const_spec(w) for w in weights]                     # VMEM-resident
    )
    out_spec = pl.BlockSpec((bt4, W), lambda i: (i, 0))

    kernel = functools.partial(_rollout_kernel, T, K, p)
    out = pl.pallas_call(
        kernel,
        grid=grid,
        in_specs=in_specs,
        out_specs=out_spec,
        out_shape=jax.ShapeDtypeStruct((B4p, W), jnp.float32),
        compiler_params=pltpu.CompilerParams(
            dimension_semantics=("parallel",)),   # 2 TCs on v7x share batch
    )(theta_packed, eps_packed, pool, *weights)

    # ---- unpack the combined slab back to per-step designs / observations ----
    step = P4 + PACK
    designs, observations = [], []
    for t in range(T):
        xi_pk = out[:, t * step: t * step + P4]          # (B4p, PACK*p)
        y_pk = out[:, t * step + P4: (t + 1) * step]     # (B4p, PACK)
        designs.append(xi_pk.reshape(Bp, p)[:B])         # (B, p)
        observations.append(y_pk.reshape(Bp, 1)[:B])     # (B, 1)
    return designs, observations


def hidden_objects_forward(theta, params, eps, T=2, block_rows_packed=256):
    """Equivalent of HiddenObjectsTest.forward(theta): run the policy for a
    given (conditioned) theta and return (designs, observations) as lists of
    (B, 1, p) and (B, 1) arrays, matching the PyTorch shapes."""
    B, K, p = theta.shape
    designs_2d, observations = rollout(theta, eps, params, T, K, p,
                                       block_rows_packed)
    designs = [d.reshape(B, 1, p) for d in designs_2d]
    return designs, observations


# --------------------------- parameter plumbing -----------------------------


def _linear_init(key, fan_in, fan_out):
    """PyTorch nn.Linear-style uniform(-1/sqrt(fan_in), 1/sqrt(fan_in))."""
    kw, kb = jax.random.split(key)
    bound = 1.0 / jnp.sqrt(jnp.asarray(fan_in, jnp.float32))
    w = jax.random.uniform(kw, (fan_in, fan_out), jnp.float32, -bound, bound)
    b = jax.random.uniform(kb, (1, fan_out), jnp.float32, -bound, bound)
    return w, b


def init_design_net_params(key, p, hidden):
    """Encoder: (p+1) -> H -> H ; Emitter: H -> H -> p."""
    k1, k2, k3, k4 = jax.random.split(key, 4)
    enc_w1, enc_b1 = _linear_init(k1, p + 1, hidden)
    enc_w2, enc_b2 = _linear_init(k2, hidden, hidden)
    emi_w1, emi_b1 = _linear_init(k3, hidden, hidden)
    emi_w2, emi_b2 = _linear_init(k4, hidden, p)
    return dict(enc_w1=enc_w1, enc_b1=enc_b1, enc_w2=enc_w2, enc_b2=enc_b2,
                emi_w1=emi_w1, emi_b1=emi_b1, emi_w2=emi_w2, emi_b2=emi_b2)


# --------------------------- pure-JAX reference ------------------------------


def reference_forward(theta, eps, params, T, K, p):
    """Unpacked, straightforward jnp rollout (same math) for validation."""
    B = theta.shape[0]
    H = params["emi_w1"].shape[0]
    hp = jax.lax.Precision.HIGHEST
    rep = jnp.zeros((B, H), jnp.float32)
    designs, obs = [], []
    for t in range(T):
        h = jnp.maximum(
            jnp.dot(rep, params["emi_w1"], precision=hp) + params["emi_b1"], 0.0)
        xi = jnp.dot(h, params["emi_w2"], precision=hp) + params["emi_b2"]
        sq = jnp.sum((xi[:, None, :] - theta) ** 2, axis=-1)          # (B, K)
        s = jnp.sum(1.0 / (MAX_SIGNAL + sq), axis=-1, keepdims=True)
        mean = jnp.log(BASE_SIGNAL + s)
        y = mean + NOISE_SCALE * eps[:, t:t + 1]
        designs.append(xi)
        obs.append(y)
        inp = jnp.concatenate([xi, y], axis=-1)
        g = jnp.maximum(
            jnp.dot(inp, params["enc_w1"], precision=hp) + params["enc_b1"], 0.0)
        rep = rep + jnp.dot(g, params["enc_w2"], precision=hp) + params["enc_b2"]
    return designs, obs


# --------------------------------- main -------------------------------------

if __name__ == "__main__":
    B, K, p, H, T = 96, 4, 2, 32, 2

    root = jax.random.PRNGKey(0)
    k_theta, k_params, k_noise = jax.random.split(root, 3)

    # theta ~ MultivariateNormal(0, I) batch -- the conditioned latent
    theta = jax.random.normal(k_theta, (B, K, p), jnp.float32)
    params = init_design_net_params(k_params, p, H)
    # All Gaussian noise for the rollout, drawn once up front.
    eps = jax.random.normal(k_noise, (B, T), jnp.float32)

    # small packed block so the run exercises a multi-step batch grid
    designs, observations = hidden_objects_forward(theta, params, eps, T=T,
                                                   block_rows_packed=8)

    for d in designs:
        jax.block_until_ready(d)
    for y in observations:
        jax.block_until_ready(y)

    assert len(designs) == T and len(observations) == T
    assert designs[0].shape == (B, 1, p)
    assert observations[0].shape == (B, 1)
    assert all(bool(jnp.all(jnp.isfinite(d))) for d in designs)
    assert all(bool(jnp.all(jnp.isfinite(y))) for y in observations)

    ref_designs, ref_obs = reference_forward(theta, eps, params, T, K, p)
    for t in range(T):
        assert bool(jnp.allclose(designs[t].reshape(B, p), ref_designs[t],
                                 atol=1e-2, rtol=1e-2))
        assert bool(jnp.allclose(observations[t], ref_obs[t],
                                 atol=1e-2, rtol=1e-2))

    print("KERNEL_OK")
</pallas_src>

<mosaic_0001>
module attributes {stable_mosaic.version = 11 : i64} {
  func.func @_rollout_kernel(%arg0: i32, %arg1: memref<4x8x8xf32, #tpu.memory_space<vmem>>, %arg2: memref<2x8x4xf32, #tpu.memory_space<vmem>>, %arg3: memref<8x4xf32, #tpu.memory_space<vmem>>, %arg4: memref<128x128xf32, #tpu.memory_space<vmem>>, %arg5: memref<1x128xf32, #tpu.memory_space<vmem>>, %arg6: memref<128x8xf32, #tpu.memory_space<vmem>>, %arg7: memref<1x8xf32, #tpu.memory_space<vmem>>, %arg8: memref<8x128xf32, #tpu.memory_space<vmem>>, %arg9: memref<4x128xf32, #tpu.memory_space<vmem>>, %arg10: memref<1x128xf32, #tpu.memory_space<vmem>>, %arg11: memref<128x128xf32, #tpu.memory_space<vmem>>, %arg12: memref<1x128xf32, #tpu.memory_space<vmem>>, %arg13: memref<8x24xf32, #tpu.memory_space<vmem>>) attributes {dimension_semantics = [#tpu.dimension_semantics<parallel>], iteration_bounds = array<i64: 3>, scalar_prefetch = 0 : i64, scratch_operands = 0 : i64, tpu.core_type = #tpu.core_type<tc>, window_params = [{transform_indices = @transform_0, window_bounds = array<i64: 4, 8, 8>}, {transform_indices = @transform_1, window_bounds = array<i64: 2, 8, 4>}, {pipeline_mode = #tpu.pipeline_mode<synchronous>, transform_indices = @transform_2, window_bounds = array<i64: 8, 4>}, {pipeline_mode = #tpu.pipeline_mode<synchronous>, transform_indices = @transform_3, window_bounds = array<i64: 128, 128>}, {pipeline_mode = #tpu.pipeline_mode<synchronous>, transform_indices = @transform_4, window_bounds = array<i64: 1, 128>}, {pipeline_mode = #tpu.pipeline_mode<synchronous>, transform_indices = @transform_5, window_bounds = array<i64: 128, 8>}, {pipeline_mode = #tpu.pipeline_mode<synchronous>, transform_indices = @transform_6, window_bounds = array<i64: 1, 8>}, {pipeline_mode = #tpu.pipeline_mode<synchronous>, transform_indices = @transform_7, window_bounds = array<i64: 8, 128>}, {pipeline_mode = #tpu.pipeline_mode<synchronous>, transform_indices = @transform_8, window_bounds = array<i64: 4, 128>}, {pipeline_mode = #tpu.pipeline_mode<synchronous>, transform_indices = @transform_9, window_bounds = array<i64: 1, 128>}, {pipeline_mode = #tpu.pipeline_mode<synchronous>, transform_indices = @transform_10, window_bounds = array<i64: 128, 128>}, {pipeline_mode = #tpu.pipeline_mode<synchronous>, transform_indices = @transform_11, window_bounds = array<i64: 1, 128>}, {transform_indices = @transform_12, window_bounds = array<i64: 8, 24>}]} {
    %c0 = arith.constant 0 : index
    %c0_0 = arith.constant 0 : index
    %0 = vector.load %arg4[%c0, %c0_0] : memref<128x128xf32, #tpu.memory_space<vmem>>, vector<128x128xf32>
    %c0_1 = arith.constant 0 : index
    %c0_2 = arith.constant 0 : index
    %1 = vector.load %arg5[%c0_1, %c0_2] : memref<1x128xf32, #tpu.memory_space<vmem>>, vector<1x128xf32>
    %c0_3 = arith.constant 0 : index
    %c0_4 = arith.constant 0 : index
    %2 = vector.load %arg6[%c0_3, %c0_4] : memref<128x8xf32, #tpu.memory_space<vmem>>, vector<128x8xf32>
    %c0_5 = arith.constant 0 : index
    %c0_6 = arith.constant 0 : index
    %3 = vector.load %arg7[%c0_5, %c0_6] : memref<1x8xf32, #tpu.memory_space<vmem>>, vector<1x8xf32>
    %c0_7 = arith.constant 0 : index
    %c0_8 = arith.constant 0 : index
    %4 = vector.load %arg8[%c0_7, %c0_8] : memref<8x128xf32, #tpu.memory_space<vmem>>, vector<8x128xf32>
    %c0_9 = arith.constant 0 : index
    %c0_10 = arith.constant 0 : index
    %5 = vector.load %arg9[%c0_9, %c0_10] : memref<4x128xf32, #tpu.memory_space<vmem>>, vector<4x128xf32>
    %c0_11 = arith.constant 0 : index
    %c0_12 = arith.constant 0 : index
    %6 = vector.load %arg10[%c0_11, %c0_12] : memref<1x128xf32, #tpu.memory_space<vmem>>, vector<1x128xf32>
    %c0_13 = arith.constant 0 : index
    %c0_14 = arith.constant 0 : index
    %7 = vector.load %arg11[%c0_13, %c0_14] : memref<128x128xf32, #tpu.memory_space<vmem>>, vector<128x128xf32>
    %c0_15 = arith.constant 0 : index
    %c0_16 = arith.constant 0 : index
    %8 = vector.load %arg12[%c0_15, %c0_16] : memref<1x128xf32, #tpu.memory_space<vmem>>, vector<1x128xf32>
    %c0_17 = arith.constant 0 : index
    %c0_18 = arith.constant 0 : index
    %9 = vector.load %arg3[%c0_17, %c0_18] : memref<8x4xf32, #tpu.memory_space<vmem>>, vector<8x4xf32>
    %cst = arith.constant 0.000000e+00 : f32
    %10 = vector.broadcast %cst : f32 to vector<8x128xf32>
    %cst_19 = arith.constant dense<0.000000e+00> : vector<8x128xf32>
    %11 = tpu.matmul %10, %0, %cst_19 {dimension_numbers = #tpu.dot_dimension_numbers<[1], [0], [0], [1], [0, 0, 1, 1], [], []>} : vector<8x128xf32>, vector<128x128xf32>, vector<8x128xf32> -> vector<8x128xf32>
    %12 = vector.broadcast %1 : vector<1x128xf32> to vector<8x128xf32>
    %13 = arith.addf %11, %12 : vector<8x128xf32>
    %cst_20 = arith.constant 0.000000e+00 : f32
    %14 = vector.broadcast %cst_20 : f32 to vector<8x128xf32>
    %15 = arith.maximumf %13, %14 : vector<8x128xf32>
    %cst_21 = arith.constant dense<0.000000e+00> : vector<8x8xf32>
    %16 = tpu.matmul %15, %2, %cst_21 {dimension_numbers = #tpu.dot_dimension_numbers<[1], [0], [0], [1], [0, 0, 1, 1], [], []>} : vector<8x128xf32>, vector<128x8xf32>, vector<8x8xf32> -> vector<8x8xf32>
    %17 = vector.broadcast %3 : vector<1x8xf32> to vector<8x8xf32>
    %18 = arith.addf %16, %17 : vector<8x8xf32>
    %cst_22 = arith.constant 0.000000e+00 : f32
    %19 = vector.broadcast %cst_22 : f32 to vector<8x4xf32>
    %c0_23 = arith.constant 0 : index
    %c0_24 = arith.constant 0 : index
    %c0_25 = arith.constant 0 : index
    %20 = vector.load %arg1[%c0_23, %c0_24, %c0_25] : memref<4x8x8xf32, #tpu.memory_space<vmem>>, vector<1x8x8xf32>
    %21 = vector.shape_cast %20 : vector<1x8x8xf32> to vector<8x8xf32>
    %22 = arith.subf %18, %21 : vector<8x8xf32>
    %23 = arith.mulf %22, %22 : vector<8x8xf32>
    %cst_26 = arith.constant dense<0.000000e+00> : vector<8x4xf32>
    %24 = tpu.matmul %23, %9, %cst_26 {dimension_numbers = #tpu.dot_dimension_numbers<[1], [0], [0], [1], [0, 0, 1, 1], [], []>} : vector<8x8xf32>, vector<8x4xf32>, vector<8x4xf32> -> vector<8x4xf32>
    %cst_27 = arith.constant 9.99999974E-5 : f32
    %25 = vector.broadcast %cst_27 : f32 to vector<8x4xf32>
    %26 = arith.addf %25, %24 : vector<8x4xf32>
    %cst_28 = arith.constant 1.000000e+00 : f32
    %27 = vector.broadcast %cst_28 : f32 to vector<8x4xf32>
    %28 = arith.divf %27, %26 : vector<8x4xf32>
    %29 = arith.addf %19, %28 : vector<8x4xf32>
    %c1 = arith.constant 1 : index
    %c0_29 = arith.constant 0 : index
    %c0_30 = arith.constant 0 : index
    %30 = vector.load %arg1[%c1, %c0_29, %c0_30] : memref<4x8x8xf32, #tpu.memory_space<vmem>>, vector<1x8x8xf32>
    %31 = vector.shape_cast %30 : vector<1x8x8xf32> to vector<8x8xf32>
    %32 = arith.subf %18, %31 : vector<8x8xf32>
    %33 = arith.mulf %32, %32 : vector<8x8xf32>
    %cst_31 = arith.constant dense<0.000000e+00> : vector<8x4xf32>
    %34 = tpu.matmul %33, %9, %cst_31 {dimension_numbers = #tpu.dot_dimension_numbers<[1], [0], [0], [1], [0, 0, 1, 1], [], []>} : vector<8x8xf32>, vector<8x4xf32>, vector<8x4xf32> -> vector<8x4xf32>
    %cst_32 = arith.constant 9.99999974E-5 : f32
    %35 = vector.broadcast %cst_32 : f32 to vector<8x4xf32>
    %36 = arith.addf %35, %34 : vector<8x4xf32>
    %cst_33 = arith.constant 1.000000e+00 : f32
    %37 = vector.broadcast %cst_33 : f32 to vector<8x4xf32>
    %38 = arith.divf %37, %36 : vector<8x4xf32>
    %39 = arith.addf %29, %38 : vector<8x4xf32>
    %c2 = arith.constant 2 : index
    %c0_34 = arith.constant 0 : index
    %c0_35 = arith.constant 0 : index
    %40 = vector.load %arg1[%c2, %c0_34, %c0_35] : memref<4x8x8xf32, #tpu.memory_space<vmem>>, vector<1x8x8xf32>
    %41 = vector.shape_cast %40 : vector<1x8x8xf32> to vector<8x8xf32>
    %42 = arith.subf %18, %41 : vector<8x8xf32>
    %43 = arith.mulf %42, %42 : vector<8x8xf32>
    %cst_36 = arith.constant dense<0.000000e+00> : vector<8x4xf32>
    %44 = tpu.matmul %43, %9, %cst_36 {dimension_numbers = #tpu.dot_dimension_numbers<[1], [0], [0], [1], [0, 0, 1, 1], [], []>} : vector<8x8xf32>, vector<8x4xf32>, vector<8x4xf32> -> vector<8x4xf32>
    %cst_37 = arith.constant 9.99999974E-5 : f32
    %45 = vector.broadcast %cst_37 : f32 to vector<8x4xf32>
    %46 = arith.addf %45, %44 : vector<8x4xf32>
    %cst_38 = arith.constant 1.000000e+00 : f32
    %47 = vector.broadcast %cst_38 : f32 to vector<8x4xf32>
    %48 = arith.divf %47, %46 : vector<8x4xf32>
    %49 = arith.addf %39, %48 : vector<8x4xf32>
    %c3 = arith.constant 3 : index
    %c0_39 = arith.constant 0 : index
    %c0_40 = arith.constant 0 : index
    %50 = vector.load %arg1[%c3, %c0_39, %c0_40] : memref<4x8x8xf32, #tpu.memory_space<vmem>>, vector<1x8x8xf32>
    %51 = vector.shape_cast %50 : vector<1x8x8xf32> to vector<8x8xf32>
    %52 = arith.subf %18, %51 : vector<8x8xf32>
    %53 = arith.mulf %52, %52 : vector<8x8xf32>
    %cst_41 = arith.constant dense<0.000000e+00> : vector<8x4xf32>
    %54 = tpu.matmul %53, %9, %cst_41 {dimension_numbers = #tpu.dot_dimension_numbers<[1], [0], [0], [1], [0, 0, 1, 1], [], []>} : vector<8x8xf32>, vector<8x4xf32>, vector<8x4xf32> -> vector<8x4xf32>
    %cst_42 = arith.constant 9.99999974E-5 : f32
    %55 = vector.broadcast %cst_42 : f32 to vector<8x4xf32>
    %56 = arith.addf %55, %54 : vector<8x4xf32>
    %cst_43 = arith.constant 1.000000e+00 : f32
    %57 = vector.broadcast %cst_43 : f32 to vector<8x4xf32>
    %58 = arith.divf %57, %56 : vector<8x4xf32>
    %59 = arith.addf %49, %58 : vector<8x4xf32>
    %cst_44 = arith.constant 1.000000e-01 : f32
    %60 = vector.broadcast %cst_44 : f32 to vector<8x4xf32>
    %61 = arith.addf %60, %59 : vector<8x4xf32>
    %62 = math.log %61 : vector<8x4xf32>
    %c0_45 = arith.constant 0 : index
    %c0_46 = arith.constant 0 : index
    %c0_47 = arith.constant 0 : index
    %63 = vector.load %arg2[%c0_45, %c0_46, %c0_47] : memref<2x8x4xf32, #tpu.memory_space<vmem>>, vector<1x8x4xf32>
    %64 = vector.shape_cast %63 : vector<1x8x4xf32> to vector<8x4xf32>
    %cst_48 = arith.constant 1.000000e+00 : f32
    %65 = vector.broadcast %cst_48 : f32 to vector<8x4xf32>
    %66 = arith.mulf %65, %64 : vector<8x4xf32>
    %67 = arith.addf %62, %66 : vector<8x4xf32>
    %cst_49 = arith.constant dense<0.000000e+00> : vector<8x128xf32>
    %68 = tpu.matmul %18, %4, %cst_49 {dimension_numbers = #tpu.dot_dimension_numbers<[1], [0], [0], [1], [0, 0, 1, 1], [], []>} : vector<8x8xf32>, vector<8x128xf32>, vector<8x128xf32> -> vector<8x128xf32>
    %cst_50 = arith.constant dense<0.000000e+00> : vector<8x128xf32>
    %69 = tpu.matmul %67, %5, %cst_50 {dimension_numbers = #tpu.dot_dimension_numbers<[1], [0], [0], [1], [0, 0, 1, 1], [], []>} : vector<8x4xf32>, vector<4x128xf32>, vector<8x128xf32> -> vector<8x128xf32>
    %70 = arith.addf %68, %69 : vector<8x128xf32>
    %71 = vector.broadcast %6 : vector<1x128xf32> to vector<8x128xf32>
    %72 = arith.addf %70, %71 : vector<8x128xf32>
    %cst_51 = arith.constant 0.000000e+00 : f32
    %73 = vector.broadcast %cst_51 : f32 to vector<8x128xf32>
    %74 = arith.maximumf %72, %73 : vector<8x128xf32>
    %cst_52 = arith.constant dense<0.000000e+00> : vector<8x128xf32>
    %75 = tpu.matmul %74, %7, %cst_52 {dimension_numbers = #tpu.dot_dimension_numbers<[1], [0], [0], [1], [0, 0, 1, 1], [], []>} : vector<8x128xf32>, vector<128x128xf32>, vector<8x128xf32> -> vector<8x128xf32>
    %76 = vector.broadcast %8 : vector<1x128xf32> to vector<8x128xf32>
    %77 = arith.addf %75, %76 : vector<8x128xf32>
    %78 = arith.addf %10, %77 : vector<8x128xf32>
    %cst_53 = arith.constant dense<0.000000e+00> : vector<8x128xf32>
    %79 = tpu.matmul %78, %0, %cst_53 {dimension_numbers = #tpu.dot_dimension_numbers<[1], [0], [0], [1], [0, 0, 1, 1], [], []>} : vector<8x128xf32>, vector<128x128xf32>, vector<8x128xf32> -> vector<8x128xf32>
    %80 = vector.broadcast %1 : vector<1x128xf32> to vector<8x128xf32>
    %81 = arith.addf %79, %80 : vector<8x128xf32>
    %cst_54 = arith.constant 0.000000e+00 : f32
    %82 = vector.broadcast %cst_54 : f32 to vector<8x128xf32>
    %83 = arith.maximumf %81, %82 : vector<8x128xf32>
    %cst_55 = arith.constant dense<0.000000e+00> : vector<8x8xf32>
    %84 = tpu.matmul %83, %2, %cst_55 {dimension_numbers = #tpu.dot_dimension_numbers<[1], [0], [0], [1], [0, 0, 1, 1], [], []>} : vector<8x128xf32>, vector<128x8xf32>, vector<8x8xf32> -> vector<8x8xf32>
    %85 = vector.broadcast %3 : vector<1x8xf32> to vector<8x8xf32>
    %86 = arith.addf %84, %85 : vector<8x8xf32>
    %cst_56 = arith.constant 0.000000e+00 : f32
    %87 = vector.broadcast %cst_56 : f32 to vector<8x4xf32>
    %c0_57 = arith.constant 0 : index
    %c0_58 = arith.constant 0 : index
    %c0_59 = arith.constant 0 : index
    %88 = vector.load %arg1[%c0_57, %c0_58, %c0_59] : memref<4x8x8xf32, #tpu.memory_space<vmem>>, vector<1x8x8xf32>
    %89 = vector.shape_cast %88 : vector<1x8x8xf32> to vector<8x8xf32>
    %90 = arith.subf %86, %89 : vector<8x8xf32>
    %91 = arith.mulf %90, %90 : vector<8x8xf32>
    %cst_60 = arith.constant dense<0.000000e+00> : vector<8x4xf32>
    %92 = tpu.matmul %91, %9, %cst_60 {dimension_numbers = #tpu.dot_dimension_numbers<[1], [0], [0], [1], [0, 0, 1, 1], [], []>} : vector<8x8xf32>, vector<8x4xf32>, vector<8x4xf32> -> vector<8x4xf32>
    %cst_61 = arith.constant 9.99999974E-5 : f32
    %93 = vector.broadcast %cst_61 : f32 to vector<8x4xf32>
    %94 = arith.addf %93, %92 : vector<8x4xf32>
    %cst_62 = arith.constant 1.000000e+00 : f32
    %95 = vector.broadcast %cst_62 : f32 to vector<8x4xf32>
    %96 = arith.divf %95, %94 : vector<8x4xf32>
    %97 = arith.addf %87, %96 : vector<8x4xf32>
    %c1_63 = arith.constant 1 : index
    %c0_64 = arith.constant 0 : index
    %c0_65 = arith.constant 0 : index
    %98 = vector.load %arg1[%c1_63, %c0_64, %c0_65] : memref<4x8x8xf32, #tpu.memory_space<vmem>>, vector<1x8x8xf32>
    %99 = vector.shape_cast %98 : vector<1x8x8xf32> to vector<8x8xf32>
    %100 = arith.subf %86, %99 : vector<8x8xf32>
    %101 = arith.mulf %100, %100 : vector<8x8xf32>
    %cst_66 = arith.constant dense<0.000000e+00> : vector<8x4xf32>
    %102 = tpu.matmul %101, %9, %cst_66 {dimension_numbers = #tpu.dot_dimension_numbers<[1], [0], [0], [1], [0, 0, 1, 1], [], []>} : vector<8x8xf32>, vector<8x4xf32>, vector<8x4xf32> -> vector<8x4xf32>
    %cst_67 = arith.constant 9.99999974E-5 : f32
    %103 = vector.broadcast %cst_67 : f32 to vector<8x4xf32>
    %104 = arith.addf %103, %102 : vector<8x4xf32>
    %cst_68 = arith.constant 1.000000e+00 : f32
    %105 = vector.broadcast %cst_68 : f32 to vector<8x4xf32>
    %106 = arith.divf %105, %104 : vector<8x4xf32>
    %107 = arith.addf %97, %106 : vector<8x4xf32>
    %c2_69 = arith.constant 2 : index
    %c0_70 = arith.constant 0 : index
    %c0_71 = arith.constant 0 : index
    %108 = vector.load %arg1[%c2_69, %c0_70, %c0_71] : memref<4x8x8xf32, #tpu.memory_space<vmem>>, vector<1x8x8xf32>
    %109 = vector.shape_cast %108 : vector<1x8x8xf32> to vector<8x8xf32>
    %110 = arith.subf %86, %109 : vector<8x8xf32>
    %111 = arith.mulf %110, %110 : vector<8x8xf32>
    %cst_72 = arith.constant dense<0.000000e+00> : vector<8x4xf32>
    %112 = tpu.matmul %111, %9, %cst_72 {dimension_numbers = #tpu.dot_dimension_numbers<[1], [0], [0], [1], [0, 0, 1, 1], [], []>} : vector<8x8xf32>, vector<8x4xf32>, vector<8x4xf32> -> vector<8x4xf32>
    %cst_73 = arith.constant 9.99999974E-5 : f32
    %113 = vector.broadcast %cst_73 : f32 to vector<8x4xf32>
    %114 = arith.addf %113, %112 : vector<8x4xf32>
    %cst_74 = arith.constant 1.000000e+00 : f32
    %115 = vector.broadcast %cst_74 : f32 to vector<8x4xf32>
    %116 = arith.divf %115, %114 : vector<8x4xf32>
    %117 = arith.addf %107, %116 : vector<8x4xf32>
    %c3_75 = arith.constant 3 : index
    %c0_76 = arith.constant 0 : index
    %c0_77 = arith.constant 0 : index
    %118 = vector.load %arg1[%c3_75, %c0_76, %c0_77] : memref<4x8x8xf32, #tpu.memory_space<vmem>>, vector<1x8x8xf32>
    %119 = vector.shape_cast %118 : vector<1x8x8xf32> to vector<8x8xf32>
    %120 = arith.subf %86, %119 : vector<8x8xf32>
    %121 = arith.mulf %120, %120 : vector<8x8xf32>
    %cst_78 = arith.constant dense<0.000000e+00> : vector<8x4xf32>
    %122 = tpu.matmul %121, %9, %cst_78 {dimension_numbers = #tpu.dot_dimension_numbers<[1], [0], [0], [1], [0, 0, 1, 1], [], []>} : vector<8x8xf32>, vector<8x4xf32>, vector<8x4xf32> -> vector<8x4xf32>
    %cst_79 = arith.constant 9.99999974E-5 : f32
    %123 = vector.broadcast %cst_79 : f32 to vector<8x4xf32>
    %124 = arith.addf %123, %122 : vector<8x4xf32>
    %cst_80 = arith.constant 1.000000e+00 : f32
    %125 = vector.broadcast %cst_80 : f32 to vector<8x4xf32>
    %126 = arith.divf %125, %124 : vector<8x4xf32>
    %127 = arith.addf %117, %126 : vector<8x4xf32>
    %cst_81 = arith.constant 1.000000e-01 : f32
    %128 = vector.broadcast %cst_81 : f32 to vector<8x4xf32>
    %129 = arith.addf %128, %127 : vector<8x4xf32>
    %130 = math.log %129 : vector<8x4xf32>
    %c1_82 = arith.constant 1 : index
    %c0_83 = arith.constant 0 : index
    %c0_84 = arith.constant 0 : index
    %131 = vector.load %arg2[%c1_82, %c0_83, %c0_84] : memref<2x8x4xf32, #tpu.memory_space<vmem>>, vector<1x8x4xf32>
    %132 = vector.shape_cast %131 : vector<1x8x4xf32> to vector<8x4xf32>
    %cst_85 = arith.constant 1.000000e+00 : f32
    %133 = vector.broadcast %cst_85 : f32 to vector<8x4xf32>
    %134 = arith.mulf %133, %132 : vector<8x4xf32>
    %135 = arith.addf %130, %134 : vector<8x4xf32>
    %136 = tpu.concatenate %18, %67, %86, %135 in 1 : vector<8x8xf32>, vector<8x4xf32>, vector<8x8xf32>, vector<8x4xf32> -> vector<8x24xf32>
    %c0_86 = arith.constant 0 : index
    %c0_87 = arith.constant 0 : index
    %137 = vector.load %arg13[%c0_86, %c0_87] : memref<8x24xf32, #tpu.memory_space<vmem>>, vector<8x24xf32>
    tpu.vector_store %arg13[%c0_86, %c0_87], %136 {strides = array<i32>} : memref<8x24xf32, #tpu.memory_space<vmem>>, vector<8x24xf32>,
    return
  }
  func.func @transform_0(%arg0: i32) -> (i32, i32, i32) {
    %c0_i32 = arith.constant 0 : i32
    %c0_i32_0 = arith.constant 0 : i32
    %c0_i32_1 = arith.constant 0 : i32
    return %c0_i32, %arg0, %c0_i32_0 : i32, i32, i32
  }
  func.func @transform_1(%arg0: i32) -> (i32, i32, i32) {
    %c0_i32 = arith.constant 0 : i32
    %c0_i32_0 = arith.constant 0 : i32
    %c0_i32_1 = arith.constant 0 : i32
    return %c0_i32, %arg0, %c0_i32_0 : i32, i32, i32
  }
  func.func @transform_2(%arg0: i32) -> (i32, i32) {
    %c0_i32 = arith.constant 0 : i32
    %c0_i32_0 = arith.constant 0 : i32
    %c0_i32_1 = arith.constant 0 : i32
    return %c0_i32, %c0_i32_0 : i32, i32
  }
  func.func @transform_3(%arg0: i32) -> (i32, i32) {
    %c0_i32 = arith.constant 0 : i32
    %c0_i32_0 = arith.constant 0 : i32
    %c0_i32_1 = arith.constant 0 : i32
    return %c0_i32, %c0_i32_0 : i32, i32
  }
  func.func @transform_4(%arg0: i32) -> (i32, i32) {
    %c0_i32 = arith.constant 0 : i32
    %c0_i32_0 = arith.constant 0 : i32
    %c0_i32_1 = arith.constant 0 : i32
    return %c0_i32, %c0_i32_0 : i32, i32
  }
  func.func @transform_5(%arg0: i32) -> (i32, i32) {
    %c0_i32 = arith.constant 0 : i32
    %c0_i32_0 = arith.constant 0 : i32
    %c0_i32_1 = arith.constant 0 : i32
    return %c0_i32, %c0_i32_0 : i32, i32
  }
  func.func @transform_6(%arg0: i32) -> (i32, i32) {
    %c0_i32 = arith.constant 0 : i32
    %c0_i32_0 = arith.constant 0 : i32
    %c0_i32_1 = arith.constant 0 : i32
    return %c0_i32, %c0_i32_0 : i32, i32
  }
  func.func @transform_7(%arg0: i32) -> (i32, i32) {
    %c0_i32 = arith.constant 0 : i32
    %c0_i32_0 = arith.constant 0 : i32
    %c0_i32_1 = arith.constant 0 : i32
    return %c0_i32, %c0_i32_0 : i32, i32
  }
  func.func @transform_8(%arg0: i32) -> (i32, i32) {
    %c0_i32 = arith.constant 0 : i32
    %c0_i32_0 = arith.constant 0 : i32
    %c0_i32_1 = arith.constant 0 : i32
    return %c0_i32, %c0_i32_0 : i32, i32
  }
  func.func @transform_9(%arg0: i32) -> (i32, i32) {
    %c0_i32 = arith.constant 0 : i32
    %c0_i32_0 = arith.constant 0 : i32
    %c0_i32_1 = arith.constant 0 : i32
    return %c0_i32, %c0_i32_0 : i32, i32
  }
  func.func @transform_10(%arg0: i32) -> (i32, i32) {
    %c0_i32 = arith.constant 0 : i32
    %c0_i32_0 = arith.constant 0 : i32
    %c0_i32_1 = arith.constant 0 : i32
    return %c0_i32, %c0_i32_0 : i32, i32
  }
  func.func @transform_11(%arg0: i32) -> (i32, i32) {
    %c0_i32 = arith.constant 0 : i32
    %c0_i32_0 = arith.constant 0 : i32
    %c0_i32_1 = arith.constant 0 : i32
    return %c0_i32, %c0_i32_0 : i32, i32
  }
  func.func @transform_12(%arg0: i32) -> (i32, i32) {
    %c0_i32 = arith.constant 0 : i32
    %c0_i32_0 = arith.constant 0 : i32
    return %arg0, %c0_i32 : i32, i32
  }
}

</mosaic_0001>

<bundles_post_ra>
// kernel: tpu_custom_call.1
= control target key start
LH: loop header
LB: loop body
LE: loop exit
PB: predicated region body
PF: predicated region fallthrough
CT: control target
= control target key end

     0   :  { %s3034_s0 = inlined_call_operand.vmem [shape: f32[4,24,8], index: 0, kind: input, shape index: {}]   ;;  %s3035_s1 = inlined_call_operand.vmem [shape: f32[2,24,4], index: 1, kind: input, shape index: {}]   ;;  %s3036_s2 = inlined_call_operand.vmem [shape: f32[8,4], index: 2, kind: input, shape index: {}]   ;;  %s3037_s3 = inlined_call_operand.vmem [shape: f32[128,128], index: 3, kind: input, shape index: {}]   ;;  %s3038_s4 = inlined_call_operand.vmem [shape: f32[1,128], index: 4, kind: input, shape index: {}]   ;;  %s3039_s5 = inlined_call_operand.vmem [shape: f32[128,8], index: 5, kind: input, shape index: {}]   ;;  %s3040_s6 = inlined_call_operand.vmem [shape: f32[1,8], index: 6, kind: input, shape index: {}]   ;;  %s3041_s7 = inlined_call_operand.vmem [shape: f32[8,128], index: 7, kind: input, shape index: {}]   ;;  %s3042_s8 = inlined_call_operand.vmem [shape: f32[4,128], index: 8, kind: input, shape index: {}]   ;;  %s3043_s9 = inlined_call_operand.vmem [shape: f32[1,128], index: 9, kind: input, shape index: {}]   ;;  %s3044_s10 = inlined_call_operand.vmem [shape: f32[128,128], index: 10, kind: input, shape index: {}]   ;;  %s3045_s11 = inlined_call_operand.vmem [shape: f32[1,128], index: 11, kind: input, shape index: {}]   ;;  %s3046_s12 = inlined_call_operand.hbm [shape: f32[24,24], index: 12, kind: output, shape index: {}]  }
   0x1   :  { %3048 = sst [smem:[#allocation7_spill]] %s3034_s0 }
   0x2   :  { %3049 = sst [smem:[#allocation8_spill]] %s3035_s1 }
   0x3   :  { %17 = vsyncpa [#allocation5], 0 }
   0x4   :  { %19 = vsyncpa [#allocation5 + $0x1], 0  ;;  %s2544_s21 = smov 0   ;;  %s2546_s22 = smov 0  }
   0x5   :  { %s2548_s23 = smov 0   ;;  %s2550_s24 = smov 0  }
   0x6 LB: > { %s3047_s25 = sadd.s32 4294967295, %s2470_s24   ;;  %s1859_s26 = sadd.s32 4294967294, %s2470_s24   ;;  %s2470_s24 = sphi %s2550_s24, %s3059_s24   ;;  %s2466_s23 = sphi %s2548_s23, %s3058_s23   ;;  %s2462_s22 = sphi %s2546_s22, %s3057_s22   ;;  %s2458_s21 = sphi %s2544_s21, %s3056_s21  }
   0x7   : > { %s2567_s27 = sadd.s32 1, %s2470_s24   ;;  %s32_s28 = sadd.s32 1, %s2466_s23 }
   0x8   : > { %s29_s29 = ssub.s32 %s2470_s24, %s2567_s27  ;;  %p39_p0 = scmp.ne.s32.totalorder %s2466_s23, %s2462_s22 }
   0x9   : > { %p30_p1 = scmp.eq.s32.totalorder %s29_s29, 0  ;;  %p40_p2 = scmp.eq.s32.totalorder %s2470_s24, 0 }
   0xa   : > { %p305_p3 = scmp.eq.s32.totalorder %s3047_s25, 2  ;;  %p310_p4 = scmp.ne.s32.totalorder %s2462_s22, %s2458_s21 }
   0xb   : > { %s2580_s30 = scalar_select %p30_p1, %s2466_s23, %s32_s28  }
   0xc   : > { %p2582_p5 = por %p40_p2, %p39_p0  ;;  %p2586_p6 = por %p305_p3, %p39_p0 }
   0xd   : > { %p311_p7 = scmp.eq.s32.totalorder %s1859_s26, 2  ;;  %p1861_p9 = scmp.ge.s32.totalorder %s2470_s24, 3 }
   0xf   : > { %p2590_p8 = por %p311_p7, %p310_p4  ;;  %357 = sbr.rel (%p1861_p9) target bundleno = 45 (0x2d), region = 56 }
  0x16   : > { %360 = sbr.rel (!%p2582_p5) target bundleno = 34 (0x22), region = 60  ;;  %s362_s16 = sand.u32 (%p2582_p5), 1, %s2466_s23  }
  0x17   : > { %s1863_s17 = sshll.u32 (%p2582_p5), %s2470_s24, 3  ;;  %s1862_s18 = sshll.u32 (%p2582_p5), %s362_s16, 5 }
  0x18   : > { %s3053_s0 = sld [smem:[#allocation7_spill]] (%p2582_p5)  ;;  %s364_s26 = scalar_lea.vmem (%p2582_p5), [#allocation2], %s1862_s18 }
  0x1e   : > { %s366_s28 = scalar_lea.vmem %s3053_s0, %s1863_s17 }
  0x1f   : > { %v400_v0 = vld [vmem:[%s366_s28] sm:$0xff]  ;;  %v402_v1 = vld [vmem:[%s366_s28 + $0x18] sm:$0xff]  ;;  %v404_v2 = vld [vmem:[%s366_s28 + $0x30] sm:$0xff] }
  0x20   : > { %401 = vst [vmem:[%s364_s26] sm:$0xff] %v400_v0  ;;  %403 = vst [vmem:[%s364_s26 + $0x8] sm:$0xff] %v402_v1  ;;  %v406_v3 = vld [vmem:[%s366_s28 + $0x48] sm:$0xff] }
  0x21   : > { %405 = vst [vmem:[%s364_s26 + $0x10] sm:$0xff] %v404_v2  ;;  %407 = vst [vmem:[%s364_s26 + $0x18] sm:$0xff] %v406_v3 }
  0x22 PF: > { %413 = sbr.rel (!%p2582_p5) target bundleno = 45 (0x2d), region = 98  ;;  %s415_s29 = sand.u32 (%p2582_p5), 1, %s2466_s23  }
  0x23   : > { %s1865_s16 = sshll.u32 (%p2582_p5), %s2470_s24, 3  ;;  %s1864_s25 = sshll.u32 (%p2582_p5), %s415_s29, 4 }
  0x24   : > { %s3054_s1 = sld [smem:[#allocation8_spill]] (%p2582_p5)  ;;  %s417_s18 = scalar_lea.vmem (%p2582_p5), [#allocation3], %s1864_s25 }
  0x2a   : > { %s419_s20 = scalar_lea.vmem %s3054_s1, %s1865_s16 }
  0x2b   : > { %v449_v4 = vld [vmem:[%s419_s20] sm:$0xff]  ;;  %v451_v5 = vld [vmem:[%s419_s20 + $0x18] sm:$0xff] }
  0x2c   : > { %450 = vst [vmem:[%s417_s18] sm:$0xff] %v449_v4  ;;  %452 = vst [vmem:[%s417_s18 + $0x8] sm:$0xff] %v451_v5 }
  0x2d PF: > { %p1866_p10 = scmp.ge.s32.totalorder %s2470_s24, 1  ;;  %p457_p11 = scmp.lt.s32.totalorder %s2470_s24, 4 }
  0x2f   : > { %p458_p12 = pnand %p1866_p10, %p457_p11 }
  0x30   : > { %v516_v6 = vld [vmem:[%s3037_s3] sm:$0xff] (!%p458_p12)  ;;  %v517_v7 = vld [vmem:[%s3037_s3 + $0x8] sm:$0xff] (!%p458_p12)  ;;  %v518_v8 = vld [vmem:[%s3037_s3 + $0x10] sm:$0xff] (!%p458_p12)  ;;  %v2472_v9 = vmov (!%p458_p12), 0.0|0.0   ;;  %vm2473_vm0 = vmmov (!%p458_p12), 0   ;;  %v2474_v12 = vmov (!%p458_p12), 0.0  }
  0x31   : > { %461 = sbr.rel (%p458_p12) target bundleno = 2024 (0x7e8), region = 136  ;;  %2223 = vmatprep.subr.bf16.mxu0 (!%p458_p12), %v2472_v9  ;;  %v2621_v10 = vpack.c.bf16 (!%p458_p12), %v517_v7, %v516_v6  ;;  %v519_v11 = vld [vmem:[%s3037_s3 + $0x18] sm:$0xff] (!%p458_p12)  ;;  %2030 = vmatprep.mubr.msk.f32.mxu0 (!%p458_p12), %vm2473_vm0, %v2474_v12  ;;  %v520_v14 = vld [vmem:[%s3037_s3 + $0x20] sm:$0xff] (!%p458_p12)  ;;  %v521_v15 = vld [vmem:[%s3037_s3 + $0x28] sm:$0xff] (!%p458_p12)  ;;  %s2796_s20 = sand.u32 (!%p458_p12), 1, %s2462_s22   ;;  %vm727_vm1 = vcmask (!%p458_p12), 64512  }
  0x32   : > { %2247 = vmatprep.subr.bf16.mxu1 (!%p458_p12), %v2472_v9  ;;  %2065 = vmatprep.mubr.msk.f32.mxu1 (!%p458_p12), %vm2473_vm0, %v2474_v12  ;;  %v2632_v13 = vpack.c.bf16 (!%p458_p12), %v519_v11, %v518_v8  ;;  %v533_v16 = vld [vmem:[%s3039_s5] sm:$0xff] (!%p458_p12)  ;;  %v534_v17 = vld [vmem:[%s3039_s5 + $0x8] sm:$0xff] (!%p458_p12)  ;;  %v535_v19 = vld [vmem:[%s3039_s5 + $0x10] sm:$0xff] (!%p458_p12)  ;;  %v2656_v21 = vpack.c.bf16 (!%p458_p12), %v521_v15, %v520_v14  ;;  %s1867_s18 = sshll.u32 (!%p458_p12), %s2796_s20, 5  ;;  %vm1053_vm2 = vcmask (!%p458_p12), 1043456   ;;  %s1868_s17 = sshll.u32 (!%p458_p12), %s2796_s20, 4 }
  0x33   : > { %2225 = vmatpush3.bf16.msra.mxu0 (!%p458_p12), %v2621_v10  ;;  %v2647_v18 = vpack.c.bf16 (!%p458_p12), %v534_v17, %v533_v16  ;;  %v536_v20 = vld [vmem:[%s3039_s5 + $0x18] sm:$0xff] (!%p458_p12)  ;;  %v522_v22 = vld [vmem:[%s3037_s3 + $0x30] sm:$0xff] (!%p458_p12)  ;;  %v537_v25 = vld [vmem:[%s3039_s5 + $0x20] sm:$0xff] (!%p458_p12)  ;;  %s466_s26 = scalar_lea.vmem (!%p458_p12), [#allocation2], %s1867_s18  ;;  %s2878_s29 = scalar_lea.vmem (!%p458_p12), [#allocation3], %s1868_s17  ;;  %vm1049_vm3 = vcmask (!%p458_p12), 31744  }
  0x34   : > { %2226 = vmatprep.subr.bf16.mxu0 (!%p458_p12), %v2472_v9  ;;  %v523_v23 = vld [vmem:[%s3037_s3 + $0x38] sm:$0xff] (!%p458_p12)  ;;  %v2666_v24 = vpack.c.bf16 (!%p458_p12), %v536_v20, %v535_v19  ;;  %v538_v26 = vld [vmem:[%s3039_s5 + $0x28] sm:$0xff] (!%p458_p12)  ;;  %v524_v28 = vld [vmem:[%s3037_s3 + $0x40] sm:$0xff] (!%p458_p12)  ;;  %s2475_s13 = smov (!%p458_p12), 8   ;;  %s2476_s25 = smov (!%p458_p12), 12   ;;  %vm1756_vm4 = vcmask (!%p458_p12), 97280  }
  0x35   : > { %2249 = vmatpush3.bf16.msra.mxu1 (!%p458_p12), %v2647_v18  ;;  %v2676_v27 = vpack.c.bf16 (!%p458_p12), %v523_v23, %v522_v22  ;;  %v525_v29 = vld [vmem:[%s3037_s3 + $0x48] sm:$0xff] (!%p458_p12)  ;;  %v2686_v30 = vpack.c.bf16 (!%p458_p12), %v538_v26, %v537_v25  ;;  %v539_v31 = vld [vmem:[%s3039_s5 + $0x30] sm:$0xff] (!%p458_p12)  ;;  %v540_v32 = vld [vmem:[%s3039_s5 + $0x38] sm:$0xff] (!%p458_p12)  ;;  %s2477_s19 = smov (!%p458_p12), 20   ;;  %s1869_s18 = sshll.u32 (!%p458_p12), %s2796_s20, 3  ;;  %vm1758_vm5 = vcmask (!%p458_p12), 162816  }
  0x36   : > { %2250 = vmatprep.subr.bf16.mxu1 (!%p458_p12), %v2472_v9  ;;  %v2696_v33 = vpack.c.bf16 (!%p458_p12), %v525_v29, %v524_v28  ;;  %v526_v34 = vld [vmem:[%s3037_s3 + $0x50] sm:$0xff] (!%p458_p12)  ;;  %v527_v35 = vld [vmem:[%s3037_s3 + $0x58] sm:$0xff] (!%p458_p12)  ;;  %v2706_v36 = vpack.c.bf16 (!%p458_p12), %v540_v32, %v539_v31  ;;  %v541_v37 = vld [vmem:[%s3039_s5 + $0x40] sm:$0xff] (!%p458_p12)  ;;  %s515_s28 = scalar_lea.vmem (!%p458_p12), [#allocation4], %s1869_s18  ;;  %vm1760_vm6 = vcmask (!%p458_p12), 195584  }
  0x37   : > { %2228 = vmatpush3.bf16.msra.mxu0 (!%p458_p12), %v2632_v13  ;;  %v542_v38 = vld [vmem:[%s3039_s5 + $0x48] sm:$0xff] (!%p458_p12)  ;;  %v2716_v39 = vpack.c.bf16 (!%p458_p12), %v527_v35, %v526_v34  ;;  %v528_v40 = vld [vmem:[%s3037_s3 + $0x60] sm:$0xff] (!%p458_p12)  ;;  %v543_v43 = vld [vmem:[%s3039_s5 + $0x50] sm:$0xff] (!%p458_p12) }
  0x38   : > { %2229 = vmatprep.subr.bf16.mxu0 %v2472_v9  ;;  %v529_v41 = vld [vmem:[%s3037_s3 + $0x68] sm:$0xff]  ;;  %v2726_v42 = vpack.c.bf16 %v542_v38, %v541_v37  ;;  %v544_v44 = vld [vmem:[%s3039_s5 + $0x58] sm:$0xff]  ;;  %v530_v46 = vld [vmem:[%s3037_s3 + $0x70] sm:$0xff] }
  0x39   : > { %2252 = vmatpush3.bf16.msra.mxu1 %v2666_v24  ;;  %v2736_v45 = vpack.c.bf16 %v529_v41, %v528_v40  ;;  %v531_v47 = vld [vmem:[%s3037_s3 + $0x78] sm:$0xff]  ;;  %v2746_v48 = vpack.c.bf16 %v544_v44, %v543_v43  ;;  %v545_v49 = vld [vmem:[%s3039_s5 + $0x60] sm:$0xff]  ;;  %v546_v50 = vld [vmem:[%s3039_s5 + $0x68] sm:$0xff] }
  0x3a   : > { %2253 = vmatprep.subr.bf16.mxu1 %v2472_v9  ;;  %v2756_v51 = vpack.c.bf16 %v531_v47, %v530_v46  ;;  %v2760_v52 = vpack.c.bf16 %v546_v50, %v545_v49  ;;  %v547_v53 = vld [vmem:[%s3039_s5 + $0x70] sm:$0xff]  ;;  %v548_v54 = vld [vmem:[%s3039_s5 + $0x78] sm:$0xff]  ;;  %v2783_v56 = vld [vmem:[%s3038_s4] ss:$0 sm:$0xff] }
  0x3b   : > { %2231 = vmatpush3.bf16.msra.mxu0 %v2656_v21  ;;  %v2776_v55 = vpack.c.bf16 %v548_v54, %v547_v53  ;;  %v2791_v61 = vld [vmem:[%s3036_s2] sm:$0xff]  ;;  %v2809_v3 = vld [vmem:[%s466_s26 + $0x8] sm:$0xff]  ;;  %v2815_v7 = vld [vmem:[%s466_s26 + $0x10] sm:$0xff] }
  0x3c   : > { %2232 = vmatprep.subr.bf16.mxu0 %v2472_v9  ;;  %v2802_v62 = vld [vmem:[%s3040_s6] ss:$0 sm:$0xff]  ;;  %v2824_v14 = vld [vmem:[%s466_s26 + $0x18] sm:$0xff]  ;;  %v554_v46 = vld [vmem:[%s3044_s10 + $0x8] sm:$0xff] }
  0x3d   : > { %2255 = vmatpush3.bf16.msra.mxu1 %v2686_v30  ;;  %v2804_v0 = vld [vmem:[%s466_s26] sm:$0xff]  ;;  %v555_v54 = vld [vmem:[%s3044_s10 + $0x10] sm:$0xff]  ;;  %s1776_s26 = sshll.u32 %s515_s28, 4  ;;  %s2993_s26 = int_to_ptr.vmem [resolvable:$true] %s1776_s26 }
  0x3e   : > { %2256 = vmatprep.subr.bf16.mxu1 %v2472_v9  ;;  %v550_v19 = vld [vmem:[%s3041_s7] sm:$0xff]  ;;  %s2408_s18 = scalar_lea.vmem %s2993_s26, 128 }
  0x3f   : > { %2234 = vmatpush3.bf16.msra.mxu0 %v2676_v27  ;;  %v1047_v49 = vld [vmem:[%s2878_s29] sm:$0xff]  ;;  %p2409_p13 = scmp.ne.s32.totalorder %s2993_s26, %s2408_s18 }
  0x40   : > { %2235 = vmatprep.subr.bf16.mxu0 %v2472_v9 }
  0x41   : > { %2258 = vmatpush3.bf16.msra.mxu1 %v2706_v36  ;;  %p2410_p0 = pnand %p2409_p13, %p2586_p6 }
  0x42   : > { %2259 = vmatprep.subr.bf16.mxu1 %v2472_v9 }
  0x43   : > { %2237 = vmatpush3.bf16.msra.mxu0 %v2696_v33  ;;  %p2411_p1 = pneg %p2410_p0 }
  0x44   : > { %2238 = vmatprep.subr.bf16.mxu0 %v2472_v9 }
  0x45   : > { %2261 = vmatpush3.bf16.msra.mxu1 %v2726_v42 }
  0x46   : > { %2262 = vmatprep.subr.bf16.mxu1 %v2472_v9 }
  0x47   : > { %2240 = vmatpush3.bf16.msra.mxu0 %v2716_v39 }
  0x48   : > { %2241 = vmatprep.subr.bf16.mxu0 %v2472_v9 }
  0x49   : > { %2264 = vmatpush3.bf16.msra.mxu1 %v2746_v48 }
  0x4a   : > { %2265 = vmatprep.subr.bf16.mxu1 %v2472_v9 }
  0x4b   : > { %2243 = vmatpush3.bf16.msra.mxu0 %v2736_v45 }
  0x4c   : > { %2244 = vmatprep.subr.bf16.mxu0 %v2472_v9 }
  0x4d   : > { %2267 = vmatpush3.bf16.msra.mxu1 %v2760_v52 }
  0x4e   : > { %2268 = vmatprep.subr.bf16.mxu1 %v2472_v9 }
  0x4f   : > { %2246 = vmatpush3.bf16.msra.mxu0 %v2756_v51 }
  0x50   : > { %2088 = vmatprep.subr.mxu0 %v2474_v12 }
  0x51   : > { %2270 = vmatpush3.bf16.msra.mxu1 %v2776_v55 }
  0x52   : > { %2031 = vmatmul.mubr.f32.vlgmr.msra.gmra.mrb[0].mxu0 %v2474_v12  ;;  %2068 = vmatprep.subr.mxu1 %v2474_v12 }
  0x53   : > { %2090 = vmatprep.mubr.msk.f32.mxu0 %vm2473_vm0, %v2474_v12 }
 0x125   : > { %v643_v57 = vpop.f32.mrb[0].mxu0 }
 0x126   : > { %v644_v58 = vadd.f32 %v2783_v56, %v643_v57  ;;  %v2032_v59 = vpop.f32.mrb[1].mxu0  ;;  %v556_v57 = vld [vmem:[%s3044_s10 + $0x18] sm:$0xff] }
 0x127   : > { %v557_v59 = vld [vmem:[%s3044_s10 + $0x20] sm:$0xff] }
 0x128   : > { %v647_v60 = vmax.f32 %v644_v58, 0.0  ;;  %v2275_v58 = vpack.c.bf16 %v556_v57, %v555_v54 }
 0x12a   : > { %2066 = vmatmul.mubr.f32.vlgmr.msra.gmra.mrb[0].mxu1 %v647_v60  ;;  %v558_v60 = vld [vmem:[%s3044_s10 + $0x28] sm:$0xff] }
 0x12b   : > { %2070 = vmatprep.mubr.msk.f32.mxu1 %vm2473_vm0, %v2474_v12  ;;  %2069 = vmatpush3.msra.mxu1 %v2791_v61 }
 0x12c   : > { %2073 = vmatprep.subr.mxu1 %v2474_v12 }
 0x1fd   : > { %v720_v63 = vpop.f32.mrb[0].mxu1 }
 0x1fe   : > { %v2807_v1 = vadd.f32 %v2802_v62, %v720_v63  ;;  %v2067_v2 = vpop.f32.mrb[1].mxu1  ;;  %v2278_v63 = vpack.c.bf16 %v558_v60, %v557_v59  ;;  %v1888_v60 = vld [vmem:[%s2878_s29 + $0x8] sm:$0xff] }
 0x1ff   : > { %v559_v2 = vld [vmem:[%s3044_s10 + $0x30] sm:$0xff] }
 0x200   : > { %v725_v4 = vsub.f32 %v2807_v1, %v2804_v0  ;;  %v806_v6 = vsub.f32 %v2807_v1, %v2809_v3  ;;  %v886_v11 = vsub.f32 %v2807_v1, %v2815_v7  ;;  %v966_v16 = vsub.f32 %v2807_v1, %v2824_v14 }
 0x202   : > { %v726_v5 = vmul.f32 %v725_v4, %v725_v4  ;;  %v807_v8 = vmul.f32 %v806_v6, %v806_v6  ;;  %v887_v15 = vmul.f32 %v886_v11, %v886_v11  ;;  %v967_v17 = vmul.f32 %v966_v16, %v966_v16  ;;  %v560_v4 = vld [vmem:[%s3044_s10 + $0x38] sm:$0xff]  ;;  %v561_v6 = vld [vmem:[%s3044_s10 + $0x40] sm:$0xff] }
 0x203   : > { %v564_v16 = vld [vmem:[%s3044_s10 + $0x58] sm:$0xff] }
 0x204   : > { %2071 = vmatmul.mubr.msk.f32.vlgmr.msra.gmra.mrb[2].mxu1 %vm727_vm1, %v726_v5  ;;  %v2281_v5 = vpack.c.bf16 %v560_v4, %v559_v2 }
 0x205   : > { %2074 = vmatpush3.msra.mxu1 %v2791_v61  ;;  %2075 = vmatprep.mubr.msk.f32.mxu1 %vm2473_vm0, %v2474_v12 }
 0x206   : > { %2078 = vmatprep.subr.mxu1 %v2474_v12 }
 0x208   : > { %2076 = vmatmul.mubr.msk.f32.vlgmr.msra.gmra.mrb[4].mxu1 %vm727_vm1, %v807_v8  ;;  %v562_v8 = vld [vmem:[%s3044_s10 + $0x48] sm:$0xff] }
 0x209   : > { %2079 = vmatpush3.msra.mxu1 %v2791_v61  ;;  %2080 = vmatprep.mubr.msk.f32.mxu1 %vm2473_vm0, %v2474_v12  ;;  %v2284_v11 = vpack.c.bf16 %v562_v8, %v561_v6 }
 0x20a   : > { %2083 = vmatprep.subr.mxu1 %v2474_v12 }
 0x20c   : > { %2081 = vmatmul.mubr.msk.f32.vlgmr.msra.gmra.mrb[6].mxu1 %vm727_vm1, %v887_v15  ;;  %v563_v15 = vld [vmem:[%s3044_s10 + $0x50] sm:$0xff] }
 0x20d   : > { %2084 = vmatpush3.msra.mxu1 %v2791_v61  ;;  %2085 = vmatprep.mubr.msk.f32.mxu1 %vm2473_vm0, %v2474_v12 }
 0x20e   : > { %2093 = vmatprep.subr.mxu1 %v2474_v12 }
 0x210   : > { %2086 = vmatmul.mubr.msk.f32.vlgmr.msra.gmra.mrb[8].mxu1 %vm727_vm1, %v967_v17  ;;  %v2287_v17 = vpack.c.bf16 %v564_v16, %v563_v15 }
 0x211   : > { %2094 = vmatpush3.msra.mxu1 %v550_v19  ;;  %2095 = vmatprep.mubr.msk.f32.mxu1 %vm2473_vm0, %v2474_v12  ;;  %v565_v19 = vld [vmem:[%s3044_s10 + $0x60] sm:$0xff] }
 0x212   : > { %2295 = vmatprep.subr.bf16.mxu1 %v2472_v9 }
 0x214   : > { %2096 = vmatmul.mubr.msk.f32.vlgmr.msra.gmra.mrb[10].mxu1 %vm727_vm1, %v2807_v1 }
 0x215   : > { %2297 = vmatpush3.bf16.msra.mxu1 %v2621_v10  ;;  %2165 = vmatprep.mubr.msk.f32.mxu1 %vm2473_vm0, %v2474_v12  ;;  %v551_v10 = vld [vmem:[%s3042_s8] sm:$0xf] }
 0x216   : > { %2298 = vmatprep.subr.bf16.mxu1 %v2472_v9  ;;  %2089 = vmatpush3.msk.msra.mxu0 %vm1053_vm2, %v551_v10  ;;  %v566_v10 = vld [vmem:[%s3044_s10 + $0x68] sm:$0xff] }
 0x217   : > { %2271 = vmatprep.subr.bf16.mxu0 %v2472_v9 }
 0x219   : > { %2300 = vmatpush3.bf16.msra.mxu1 %v2632_v13 }
 0x21a   : > { %2301 = vmatprep.subr.bf16.mxu1 %v2472_v9 }
 0x21d   : > { %2303 = vmatpush3.bf16.msra.mxu1 %v2656_v21 }
 0x21e   : > { %2304 = vmatprep.subr.bf16.mxu1 %v2472_v9 }
 0x221   : > { %2306 = vmatpush3.bf16.msra.mxu1 %v2676_v27 }
 0x222   : > { %2307 = vmatprep.subr.bf16.mxu1 %v2472_v9 }
 0x225   : > { %2309 = vmatpush3.bf16.msra.mxu1 %v2696_v33 }
 0x226   : > { %2310 = vmatprep.subr.bf16.mxu1 %v2472_v9 }
 0x229   : > { %2312 = vmatpush3.bf16.msra.mxu1 %v2716_v39 }
 0x22a   : > { %2313 = vmatprep.subr.bf16.mxu1 %v2472_v9 }
 0x22d   : > { %2315 = vmatpush3.bf16.msra.mxu1 %v2736_v45  ;;  %v553_v45 = vld [vmem:[%s3044_s10] sm:$0xff] }
 0x22e   : > { %2316 = vmatprep.subr.bf16.mxu1 %v2472_v9 }
 0x231   : > { %2318 = vmatpush3.bf16.msra.mxu1 %v2756_v51  ;;  %v2272_v51 = vpack.c.bf16 %v554_v46, %v553_v45 }
 0x232   : > { %2203 = vmatprep.subr.mxu1 %v2474_v12 }
 0x2d7   : > { %v797_v13 = vpop.f32.mrb[2].mxu1 }
 0x2d8   : > { %v2072_v20 = vpop.f32.mrb[3].mxu1  ;;  %v798_v21 = vadd.f32 0.0001, %v797_v13  ;;  %v2290_v13 = vpack.c.bf16 %v566_v10, %v565_v19 }
 0x2d9   : > { %v567_v20 = vld [vmem:[%s3044_s10 + $0x70] sm:$0xff] }
 0x2da   : > { %2388 = vrcp.f32 %v798_v21  ;;  %v568_v21 = vld [vmem:[%s3044_s10 + $0x78] sm:$0xff] }
 0x2db   : > { %v877_v22 = vpop.f32.mrb[4].mxu1 }
 0x2dc   : > { %v878_v23 = vadd.f32 0.0001, %v877_v22  ;;  %v2077_v25 = vpop.f32.mrb[5].mxu1  ;;  %v2293_v22 = vpack.c.bf16 %v568_v21, %v567_v20 }
 0x2de   : > { %2390 = vrcp.f32 %v878_v23  ;;  %v1882_v23 = vld [vmem:[%s3043_s9] ss:$0 sm:$0xff] }
 0x2df   : > { %v957_v26 = vpop.f32.mrb[6].mxu1 }
 0x2e0   : > { %v958_v27 = vadd.f32 0.0001, %v957_v26  ;;  %v2082_v28 = vpop.f32.mrb[7].mxu1 }
 0x2e2   : > { %2392 = vrcp.f32 %v958_v27 }
 0x2e3   : > { %v1037_v29 = vpop.f32.mrb[8].mxu1 }
 0x2e4   : > { %v1038_v31 = vadd.f32 0.0001, %v1037_v29  ;;  %v2087_v32 = vpop.f32.mrb[9].mxu1  ;;  %v2389_v33 = vpop.eup %2388 }
 0x2e6   : > { %2394 = vrcp.f32 %v1038_v31 }
 0x2e7   : > { %v2869_v34 = vpop.f32.mrb[10].mxu1 }
 0x2e8   : > { %v2391_v35 = vpop.eup %2390  ;;  %v2097_v37 = vpop.f32.mrb[11].mxu1 }
 0x2e9   : > { %v883_v38 = vadd.f32 %v2391_v35, %v2389_v33 }
 0x2ec   : > { %v2393_v39 = vpop.eup %2392 }
 0x2ed   : > { %v963_v40 = vadd.f32 %v2393_v39, %v883_v38 }
 0x2f0   : > { %v2395_v41 = vpop.eup %2394 }
 0x2f1   : > { %v1043_v43 = vadd.f32 %v2395_v41, %v963_v40 }
 0x2f3   : > { %v1044_v44 = vadd.f32 0.1, %v1043_v43 }
 0x2f5   : > { %2396 = vlog2.f32 %v1044_v44 }
 0x2ff   : > { %v2397_v47 = vpop.eup %2396 }
 0x300   : > { %v1046_v50 = vmul.f32 0.6931472, %v2397_v47 }
 0x302   : > { %v1048_v53 = vadd.f32 %v1047_v49, %v1046_v50 }
 0x304   : > { %1744 = vrot.lane.b32.xlu0 %v1048_v53, %s2475_s13  ;;  %2091 = vmatmul.mubr.msk.f32.vlgmr.msra.gmra.mrb[2].mxu0 %vm1049_vm3, %v1048_v53  ;;  %s3055_s13 = sadd.s32 4294967295, %s2470_s24  }
 0x305   : > { %2273 = vmatpush3.bf16.msra.mxu0 %v2272_v51  ;;  %2130 = vmatprep.mubr.msk.f32.mxu0 %vm2473_vm0, %v2474_v12  ;;  %s1890_s17 = sshll.u32 %s3055_s13, 7  ;;  %s2478_s13 = smov [#allocation4]  }
 0x306   : > { %2274 = vmatprep.subr.bf16.mxu0 %v2472_v9  ;;  %s2412_s0 = sshll.u32 %s2478_s13, 4  ;;  %s2413_s0 = int_to_ptr.vmem [resolvable:$false] %s2412_s0 }
 0x307   : > { %s2414_s1 = scalar_lea.vmem %s2413_s0, 256  ;;  %p2415_p2 = scmp.lt.s32.totalorder %s2993_s26, %s2413_s0 }
 0x308   : > { %p2416_p3 = scmp.lt.s32.totalorder %s2414_s1, %s2408_s18 }
 0x309   : > { %2276 = vmatpush3.bf16.msra.mxu0 %v2275_v58 }
 0x30a   : > { %2277 = vmatprep.subr.bf16.mxu0 %v2472_v9  ;;  %p2417_p4 = por %p2416_p3, %p2415_p2 }
 0x30c   : > { %p2418_p5 = pnand %p2417_p4, %p2411_p1 }
 0x30d   : > { %2279 = vmatpush3.bf16.msra.mxu0 %v2278_v63 }
 0x30e   : > { %2280 = vmatprep.subr.bf16.mxu0 %v2472_v9 }
 0x311   : > { %2282 = vmatpush3.bf16.msra.mxu0 %v2281_v5 }
 0x312   : > { %2283 = vmatprep.subr.bf16.mxu0 %v2472_v9 }
 0x315   : > { %2285 = vmatpush3.bf16.msra.mxu0 %v2284_v11 }
 0x316   : > { %2286 = vmatprep.subr.bf16.mxu0 %v2472_v9 }
 0x319   : > { %2288 = vmatpush3.bf16.msra.mxu0 %v2287_v17 }
 0x31a   : > { %2289 = vmatprep.subr.bf16.mxu0 %v2472_v9 }
 0x31d   : > { %2291 = vmatpush3.bf16.msra.mxu0 %v2290_v13 }
 0x31e   : > { %2292 = vmatprep.subr.bf16.mxu0 %v2472_v9 }
 0x321   : > { %2294 = vmatpush3.bf16.msra.mxu0 %v2293_v22 }
 0x322   : > { %2319 = vmatprep.subr.bf16.mxu0 %v2472_v9 }
 0x376   : > { %v1745_v4 = vpop.permute.xlu0 %1744 }
 0x377   : > { %v1755_v6 = vsel %vm727_vm1, %v2807_v1, %v1745_v4 }
 0x3d7   : > { %v1123_v25 = vpop.f32.mrb[2].mxu0 }
 0x3d8   : > { %v1197_v26 = vadd.f32 %v2869_v34, %v1123_v25  ;;  %v2092_v27 = vpop.f32.mrb[3].mxu0 }
 0x3da   : > { %v1206_v28 = vadd.f32 %v1882_v23, %v1197_v26 }
 0x3dc   : > { %v1207_v29 = vmax.f32 %v1206_v28, 0.0 }
 0x3de   : > { %2131 = vmatmul.mubr.f32.vlgmr.msra.gmra.mrb[4].mxu0 %v1207_v29 }
 0x3df   : > { %2321 = vmatpush3.bf16.msra.mxu0 %v2647_v18  ;;  %2200 = vmatprep.mubr.msk.f32.mxu0 %vm2473_vm0, %v2474_v12  ;;  %v1883_v18 = vld [vmem:[%s3045_s11] ss:$0 sm:$0xff] }
 0x3e0   : > { %2322 = vmatprep.subr.bf16.mxu0 %v2472_v9 }
 0x3e3   : > { %2324 = vmatpush3.bf16.msra.mxu0 %v2666_v24 }
 0x3e4   : > { %2325 = vmatprep.subr.bf16.mxu0 %v2472_v9 }
 0x3e7   : > { %2327 = vmatpush3.bf16.msra.mxu0 %v2686_v30 }
 0x3e8   : > { %2328 = vmatprep.subr.bf16.mxu0 %v2472_v9 }
 0x3eb   : > { %2330 = vmatpush3.bf16.msra.mxu0 %v2706_v36 }
 0x3ec   : > { %2331 = vmatprep.subr.bf16.mxu0 %v2472_v9 }
 0x3ef   : > { %2333 = vmatpush3.bf16.msra.mxu0 %v2726_v42 }
 0x3f0   : > { %2334 = vmatprep.subr.bf16.mxu0 %v2472_v9 }
 0x3f3   : > { %2336 = vmatpush3.bf16.msra.mxu0 %v2746_v48 }
 0x3f4   : > { %2337 = vmatprep.subr.bf16.mxu0 %v2472_v9 }
 0x3f7   : > { %2339 = vmatpush3.bf16.msra.mxu0 %v2760_v52 }
 0x3f8   : > { %2340 = vmatprep.subr.bf16.mxu0 %v2472_v9 }
 0x3fb   : > { %2342 = vmatpush3.bf16.msra.mxu0 %v2776_v55 }
 0x4b1   : > { %v1280_v24 = vpop.f32.mrb[4].mxu0 }
 0x4b2   : > { %v1281_v30 = vadd.f32 %v1883_v18, %v1280_v24  ;;  %v2132_v36 = vpop.f32.mrb[5].mxu0 }
 0x4b4   : > { %2166 = vmatmul.mubr.f32.vlgmr.msra.gmra.mrb[12].mxu1 %v1281_v30 }
 0x4b5   : > { %2204 = vmatpush3.msra.mxu1 %v2791_v61  ;;  %2205 = vmatprep.mubr.msk.f32.mxu1 %vm2473_vm0, %v2474_v12 }
 0x4b6   : > { %2208 = vmatprep.subr.mxu1 %v2474_v12 }
 0x587   : > { %v1351_v42 = vpop.f32.mrb[12].mxu1 }
 0x588   : > { %v1352_v9 = vadd.f32 %v2783_v56, %v1351_v42  ;;  %v2167_v48 = vpop.f32.mrb[13].mxu1 }
 0x58a   : > { %v1355_v52 = vmax.f32 %v1352_v9, 0.0 }
 0x58c   : > { %2201 = vmatmul.mubr.f32.vlgmr.msra.gmra.mrb[6].mxu0 %v1355_v52 }
 0x65f   : > { %v1422_v55 = vpop.f32.mrb[6].mxu0 }
 0x660   : > { %v1423_v31 = vadd.f32 %v2802_v62, %v1422_v55  ;;  %v2202_v32 = vpop.f32.mrb[7].mxu0 }
 0x662   : > { %1748 = vrot.lane.b32.xlu0 %v1423_v31, %s2476_s25  ;;  %v1426_v33 = vsub.f32 %v1423_v31, %v2804_v0  ;;  %v1504_v35 = vsub.f32 %v1423_v31, %v2809_v3  ;;  %v1582_v62 = vsub.f32 %v1423_v31, %v2815_v7  ;;  %v1660_v3 = vsub.f32 %v1423_v31, %v2824_v14  ;;  %s2991_s25 = scalar_lea.hbm %s3046_s12, %s1890_s17 }
 0x664   : > { %v1427_v34 = vmul.f32 %v1426_v33, %v1426_v33  ;;  %v1505_v56 = vmul.f32 %v1504_v35, %v1504_v35  ;;  %v1583_v0 = vmul.f32 %v1582_v62, %v1582_v62  ;;  %v1661_v7 = vmul.f32 %v1660_v3, %v1660_v3 }
 0x666   : > { %2206 = vmatmul.mubr.msk.f32.vlgmr.msra.gmra.mrb[14].mxu1 %vm727_vm1, %v1427_v34 }
 0x667   : > { %2209 = vmatpush3.msra.mxu1 %v2791_v61  ;;  %2210 = vmatprep.mubr.msk.f32.mxu1 %vm2473_vm0, %v2474_v12 }
 0x668   : > { %2213 = vmatprep.subr.mxu1 %v2474_v12 }
 0x66a   : > { %2211 = vmatmul.mubr.msk.f32.vlgmr.msra.gmra.mrb[16].mxu1 %vm727_vm1, %v1505_v56 }
 0x66b   : > { %2214 = vmatpush3.msra.mxu1 %v2791_v61  ;;  %2215 = vmatprep.mubr.msk.f32.mxu1 %vm2473_vm0, %v2474_v12 }
 0x66c   : > { %2218 = vmatprep.subr.mxu1 %v2474_v12 }
 0x66e   : > { %2216 = vmatmul.mubr.msk.f32.vlgmr.msra.gmra.mrb[18].mxu1 %vm727_vm1, %v1583_v0 }
 0x66f   : > { %2219 = vmatpush3.msra.mxu1 %v2791_v61  ;;  %2220 = vmatprep.mubr.msk.f32.mxu1 %vm2473_vm0, %v2474_v12 }
 0x672   : > { %2221 = vmatmul.mubr.msk.f32.vlgmr.msra.gmra.mrb[20].mxu1 %vm727_vm1, %v1661_v7 }
 0x6d4   : > { %v1749_v5 = vpop.permute.xlu0 %1748 }
 0x6d5   : > { %v1757_v8 = vsel %vm1756_vm4, %v1755_v6, %v1749_v5 }
 0x739   : > { %v1497_v37 = vpop.f32.mrb[14].mxu1 }
 0x73a   : > { %v2207_v38 = vpop.f32.mrb[15].mxu1  ;;  %v1498_v39 = vadd.f32 0.0001, %v1497_v37 }
 0x73c   : > { %2398 = vrcp.f32 %v1498_v39 }
 0x73d   : > { %v1575_v40 = vpop.f32.mrb[16].mxu1 }
 0x73e   : > { %v1576_v41 = vadd.f32 0.0001, %v1575_v40  ;;  %v2212_v43 = vpop.f32.mrb[17].mxu1 }
 0x740   : > { %2400 = vrcp.f32 %v1576_v41 }
 0x741   : > { %v1653_v44 = vpop.f32.mrb[18].mxu1 }
 0x742   : > { %v1654_v14 = vadd.f32 0.0001, %v1653_v44  ;;  %v2217_v45 = vpop.f32.mrb[19].mxu1 }
 0x744   : > { %2402 = vrcp.f32 %v1654_v14 }
 0x745   : > { %v1731_v61 = vpop.f32.mrb[20].mxu1 }
 0x746   : > { %v1732_v46 = vadd.f32 0.0001, %v1731_v61  ;;  %v2222_v47 = vpop.f32.mrb[21].mxu1  ;;  %v2399_v12 = vpop.eup %2398 }
 0x748   : > { %2404 = vrcp.f32 %v1732_v46 }
 0x74a   : > { %v2401_v49 = vpop.eup %2400 }
 0x74b   : > { %v1581_v50 = vadd.f32 %v2401_v49, %v2399_v12 }
 0x74e   : > { %v2403_v51 = vpop.eup %2402 }
 0x74f   : > { %v1659_v53 = vadd.f32 %v2403_v51, %v1581_v50 }
 0x752   : > { %v2405_v54 = vpop.eup %2404 }
 0x753   : > { %v1737_v57 = vadd.f32 %v2405_v54, %v1659_v53 }
 0x755   : > { %v1738_v58 = vadd.f32 0.1, %v1737_v57 }
 0x757   : > { %2406 = vlog2.f32 %v1738_v58 }
 0x761   : > { %v2407_v59 = vpop.eup %2406 }
 0x762   : > { %v1740_v63 = vmul.f32 0.6931472, %v2407_v59 }
 0x764   : > { %v1743_v2 = vadd.f32 %v1888_v60, %v1740_v63 }
 0x766   : > { %1752 = vrot.lane.b32.xlu1 %v1743_v2, %s2477_s19  ;;  %s1763_s19 = scalar_lea.sflag [#allocation5], %s2796_s20 }
 0x7d8   : > { %v1753_v11 = vpop.permute.xlu1 %1752 }
 0x7d9   : > { %v1759_v15 = vsel %vm1758_vm5, %v1757_v8, %v1753_v11 }
 0x7da   : > { %1761 = vst.msk [vmem:[%s515_s28] sm:$0xff] %vm1760_vm6, %v1759_v15 }
 0x7db   : > { %2421 = shalt.err (!%p2418_p5)
}
 0x7dc   : > { %s2422_s20 = scalar_lea.hbm %s2991_s25, 128  ;;  %s2426_s29 = scalar_lea.hbm %s3046_s12, 384 }
 0x7dd   : > { %p2423_p7 = scmp.ne.s32.totalorder %s2991_s25, %s2422_s20  ;;  %p2427_p11 = scmp.lt.u32.totalorder %s2991_s25, %s3046_s12 }
 0x7de   : > { %p2428_p12 = scmp.lt.u32.totalorder %s2426_s29, %s2422_s20  ;;  %p2430_p0 = scmp.lt.u32.totalorder %s2422_s20, %s2991_s25 }
 0x7df   : > { %p2424_p9 = pnand %p2423_p7, %p2586_p6 }
 0x7e0   : > { %p2429_p13 = por %p2428_p12, %p2427_p11 }
 0x7e1   : > { %p2425_p10 = pneg %p2424_p9 }
 0x7e2   : > { %p2431_p1 = por %p2430_p0, %p2429_p13 }
 0x7e4   : > { %p2432_p2 = pnand %p2431_p1, %p2425_p10 }
 0x7e6   : > { %2435 = shalt.err (!%p2432_p2)
}
 0x7e7   : > { %2343 = dma.vmem_to_hbm [thread:$0]  (%p2586_p6), %s2993_s26, 128, %s2991_s25, %s1763_s19  }
 0x7e8 PF: > { %p2349_p3 = scmp.ge.s32.totalorder %s2470_s24, 2  ;;  %s1788_s1 = sand.u32 1, %s2458_s21  }
 0x7e9   : > { %s1789_s18 = scalar_lea.sflag [#allocation5], %s1788_s1 }
 0x7ea   : > { %p2346_p4 = pnand %p2349_p3, %p2590_p8 }
 0x7ec   : > { %2453 = dma.done.wait (!%p2346_p4), %s1789_s18, 128  }
 0x7ed   : > { %2455 = vsyncadd (!%p2346_p4), %s1789_s18, 4294967168  ;;  %p22_p5 = scmp.ge.s32.totalorder %s2567_s27, 5   ;;  %s3056_s21 = smov %s2462_s22 }
 0x7ee   : > { %s3057_s22 = smov %s2466_s23  ;;  %s3058_s23 = smov %s2580_s30 }
 0x7ef   : > { %s3059_s24 = smov %s2567_s27  ;;  %24 = sbr.rel (!%p22_p5) target bundleno = 6 (0x6), region = 196 }
 0x7f6   :  { %1794 = vsyncpa [#allocation5], 1 }
 0x7f7   :  { %1796 = vsyncpa [#allocation5 + $0x1], 1 }

</bundles_post_ra>
